<compile_context>
chip_gen: v6e
topology: v6e:2x2x1
jax: 0.10.0
libtpu: 0.0.40
codegen_flags: <defaults>
</compile_context>

<pallas_src>
import jax
import jax.numpy as jnp
from jax import lax
from jax.experimental import pallas as pl
from jax.experimental.pallas import tpu as pltpu


# ---------------------------------------------------------------------------
# Kernel: out[i, :] += silu(x[i] @ w1[kh].T) * (x[i] @ w3[kh].T) @ w2[:, kh].T
# accumulated over the hidden (kh) grid axis.
# ---------------------------------------------------------------------------
def _fused_ffn_kernel(x_ref, w1_ref, w3_ref, w2_ref, o_ref, acc_ref):
    kh = pl.program_id(1)

    @pl.when(kh == 0)
    def _():
        acc_ref[...] = jnp.zeros_like(acc_ref)

    x = x_ref[...]                                      # (tm, dim)
    # Contract the `dim` axis of both operands (x @ W.T) — weights stay in
    # nn.Linear (hidden, dim) layout, no HBM transpose needed.
    dn = (((1,), (1,)), ((), ()))
    gate = lax.dot_general(x, w1_ref[...], dn,
                           preferred_element_type=jnp.float32)     # (tm, tkh)
    up = lax.dot_general(x, w3_ref[...], dn,
                         preferred_element_type=jnp.float32)       # (tm, tkh)
    sig = pl.reciprocal(1.0 + jnp.exp(-gate), approx=True)          # EUP
    h = (gate * sig * up).astype(x.dtype)                           # (tm, tkh)

    # Down projection strip: w2 block is (dim, tkh); contract the tkh axis of
    # both operands (h @ w2_strip.T) -> (tm, dim), accumulate in f32.
    acc_ref[...] += lax.dot_general(h, w2_ref[...], dn,
                                    preferred_element_type=jnp.float32)

    @pl.when(kh == pl.num_programs(1) - 1)
    def _():
        o_ref[...] = acc_ref[...].astype(o_ref.dtype)


# ---------------------------------------------------------------------------
# Tiling helpers
# ---------------------------------------------------------------------------
def _round_up(x: int, m: int) -> int:
    return ((x + m - 1) // m) * m


def _pick_tile(full: int, target: int, align: int) -> int:
    """Largest tile <= target that is a multiple of `align` and divides `full`.
    Falls back to the full extent (always a legal block shape)."""
    if full <= target:
        return full
    t = (min(target, full) // align) * align
    while t >= align:
        if full % t == 0:
            return t
        t -= align
    return full


def _vmem_capacity_bytes() -> int:
    try:
        return int(pltpu.get_tpu_info().vmem_capacity_bytes)
    except Exception:
        return 64 << 20  # conservative default (v7x per-TensorCore VMEM)


# ---------------------------------------------------------------------------
# Wrapper
# ---------------------------------------------------------------------------
def feed_forward(x, w1, w2, w3, *, tile_m: int = 512, tile_k_hidden: int = 512):
    """SwiGLU FFN with PyTorch nn.Linear weight layout (y = x @ W.T)."""
    orig_shape = x.shape
    dim = orig_shape[-1]
    hidden = w1.shape[0]
    assert w3.shape == (hidden, dim) and w2.shape == (dim, hidden)

    x2d = x.reshape(-1, dim)
    M = x2d.shape[0]
    out_dtype = x.dtype
    itemsize = jnp.dtype(out_dtype).itemsize

    # dtype-aware sublane alignment (8 for f32, 16 for bf16, 32 for int8/fp8)
    sub_align = max(8, 32 // itemsize)
    cap = int(0.85 * _vmem_capacity_bytes())

    tm = tile_m if M >= tile_m else _round_up(M, sub_align)
    tkh = _pick_tile(hidden, tile_k_hidden, 128)

    def footprint(tm_, tkh_):
        io = (2 * tm_ * dim            # x tile + out tile
              + 2 * tkh_ * dim         # w1 + w3 strips
              + dim * tkh_             # w2 strip
              ) * itemsize
        scratch = tm_ * dim * 4        # f32 accumulator (single-buffered)
        temps = 3 * tm_ * tkh_ * 4     # gate / up / h temporaries
        return 2 * io + scratch + temps + (2 << 20)

    # Shrink tiles until the (double-buffered) footprint fits this chip's VMEM.
    while footprint(tm, tkh) > cap:
        can_tkh = (tkh >= 256 and hidden % (tkh // 2) == 0
                   and (tkh // 2) % 128 == 0)
        can_tm = (tm >= 2 * max(sub_align, 64) and (tm // 2) % sub_align == 0)
        if can_tkh and (tkh >= tm or not can_tm):
            tkh //= 2
        elif can_tm:
            tm //= 2
        else:
            break

    # v7x megacore: keep >= 2 slices on the parallel (row) axis when there is
    # enough work, so both TensorCores get a share. No-op on tiny inputs.
    if M <= tm and tm >= 256 and (tm // 2) % sub_align == 0:
        tm //= 2

    # Pad rows to a tile multiple (output is sliced back) so the chosen tile
    # never degenerates to a full-extent block for awkward M.
    M_pad = _round_up(M, tm)
    if M_pad != M:
        x2d = jnp.pad(x2d, ((0, M_pad - M), (0, 0)))

    grid = (M_pad // tm, hidden // tkh)

    fp = footprint(tm, tkh)
    vmem_limit = int(max(32 << 20, min(fp + (8 << 20), cap)))
    vmem_limit = max(vmem_limit, fp)

    out2d = pl.pallas_call(
        _fused_ffn_kernel,
        out_shape=jax.ShapeDtypeStruct((M_pad, dim), out_dtype),
        grid_spec=pltpu.PrefetchScalarGridSpec(
            num_scalar_prefetch=0,
            grid=grid,
            in_specs=[
                pl.BlockSpec((tm, dim), lambda i, kh: (i, 0)),      # x rows
                pl.BlockSpec((tkh, dim), lambda i, kh: (kh, 0)),    # w1 strip
                pl.BlockSpec((tkh, dim), lambda i, kh: (kh, 0)),    # w3 strip
                pl.BlockSpec((dim, tkh), lambda i, kh: (0, kh)),    # w2 strip
            ],
            out_specs=pl.BlockSpec((tm, dim), lambda i, kh: (i, 0)),
            scratch_shapes=[pltpu.VMEM((tm, dim), jnp.float32)],
        ),
        compiler_params=pltpu.CompilerParams(
            dimension_semantics=("parallel", "arbitrary"),
            vmem_limit_bytes=vmem_limit),
    )(x2d, w1, w3, w2)

    if M_pad != M:
        out2d = out2d[:M]
    return out2d.reshape(orig_shape)


# ---------------------------------------------------------------------------
# Pure-JAX reference (matches the PyTorch module)
# ---------------------------------------------------------------------------
def feed_forward_ref(x, w1, w2, w3):
    h = jax.nn.silu(x @ w1.T) * (x @ w3.T)
    return h @ w2.T


if __name__ == "__main__":
    key = jax.random.PRNGKey(0)
    batch, seq, dim, hidden_dim = 2, 8, 32, 64
    k1, k2, k3, k4 = jax.random.split(key, 4)

    x = jax.random.normal(k1, (batch, seq, dim), dtype=jnp.float32)
    w1 = jax.random.normal(k2, (hidden_dim, dim), dtype=jnp.float32) / jnp.sqrt(dim)
    w3 = jax.random.normal(k3, (hidden_dim, dim), dtype=jnp.float32) / jnp.sqrt(dim)
    w2 = jax.random.normal(k4, (dim, hidden_dim), dtype=jnp.float32) / jnp.sqrt(hidden_dim)

    out = feed_forward(x, w1, w2, w3)
    jax.block_until_ready(out)

    ref = feed_forward_ref(x, w1, w2, w3)
    assert out.shape == x.shape and out.dtype == x.dtype
    max_err = jnp.max(jnp.abs(out - ref))
    assert jnp.allclose(out, ref, atol=2e-2, rtol=2e-2), f"mismatch: max abs err {max_err}"

    print("KERNEL_OK")
</pallas_src>

<mosaic_0001>
module attributes {stable_mosaic.version = 11 : i64} {
  func.func @_fused_ffn_kernel(%arg0: i32, %arg1: i32, %arg2: memref<16x32xf32, #tpu.memory_space<vmem>>, %arg3: memref<64x32xf32, #tpu.memory_space<vmem>>, %arg4: memref<64x32xf32, #tpu.memory_space<vmem>>, %arg5: memref<32x64xf32, #tpu.memory_space<vmem>>, %arg6: memref<16x32xf32, #tpu.memory_space<vmem>>, %arg7: memref<16x32xf32, #tpu.memory_space<vmem>>) attributes {dimension_semantics = [#tpu.dimension_semantics<parallel>, #tpu.dimension_semantics<arbitrary>], iteration_bounds = array<i64: 1, 1>, scalar_prefetch = 0 : i64, scratch_operands = 1 : i64, tpu.core_type = #tpu.core_type<tc>, window_params = [{transform_indices = @transform_0, window_bounds = array<i64: 16, 32>}, {transform_indices = @transform_1, window_bounds = array<i64: 64, 32>}, {transform_indices = @transform_2, window_bounds = array<i64: 64, 32>}, {transform_indices = @transform_3, window_bounds = array<i64: 32, 64>}, {transform_indices = @transform_4, window_bounds = array<i64: 16, 32>}]} {
    %c0_i32 = arith.constant 0 : i32
    %0 = arith.cmpi eq, %arg1, %c0_i32 : i32
    %1 = arith.extui %0 : i1 to i32
    %c0_i32_0 = arith.constant 0 : i32
    %2 = arith.cmpi ne, %1, %c0_i32_0 : i32
    scf.if %2 {
      %cst_18 = arith.constant 0.000000e+00 : f32
      %24 = vector.broadcast %cst_18 : f32 to vector<16x32xf32>
      %c0_19 = arith.constant 0 : index
      %c0_20 = arith.constant 0 : index
      %25 = vector.load %arg7[%c0_19, %c0_20] : memref<16x32xf32, #tpu.memory_space<vmem>>, vector<16x32xf32>
      tpu.vector_store %arg7[%c0_19, %c0_20], %24 {strides = array<i32>} : memref<16x32xf32, #tpu.memory_space<vmem>>, vector<16x32xf32>,
    } else {
    }
    %c0 = arith.constant 0 : index
    %c0_1 = arith.constant 0 : index
    %3 = vector.load %arg2[%c0, %c0_1] : memref<16x32xf32, #tpu.memory_space<vmem>>, vector<16x32xf32>
    %c0_2 = arith.constant 0 : index
    %c0_3 = arith.constant 0 : index
    %4 = vector.load %arg3[%c0_2, %c0_3] : memref<64x32xf32, #tpu.memory_space<vmem>>, vector<64x32xf32>
    %cst = arith.constant dense<0.000000e+00> : vector<16x64xf32>
    %5 = tpu.matmul %3, %4, %cst {dimension_numbers = #tpu.dot_dimension_numbers<[1], [1], [0], [0], [0, 0, 1, 0], [], []>} : vector<16x32xf32>, vector<64x32xf32>, vector<16x64xf32> -> vector<16x64xf32>
    %c0_4 = arith.constant 0 : index
    %c0_5 = arith.constant 0 : index
    %6 = vector.load %arg4[%c0_4, %c0_5] : memref<64x32xf32, #tpu.memory_space<vmem>>, vector<64x32xf32>
    %cst_6 = arith.constant dense<0.000000e+00> : vector<16x64xf32>
    %7 = tpu.matmul %3, %6, %cst_6 {dimension_numbers = #tpu.dot_dimension_numbers<[1], [1], [0], [0], [0, 0, 1, 0], [], []>} : vector<16x32xf32>, vector<64x32xf32>, vector<16x64xf32> -> vector<16x64xf32>
    %cst_7 = arith.constant 0.000000e+00 : f32
    %8 = vector.broadcast %cst_7 : f32 to vector<16x64xf32>
    %9 = arith.subf %8, %5 : vector<16x64xf32>
    %10 = math.exp %9 : vector<16x64xf32>
    %cst_8 = arith.constant 1.000000e+00 : f32
    %11 = vector.broadcast %cst_8 : f32 to vector<16x64xf32>
    %12 = arith.addf %11, %10 : vector<16x64xf32>
    %13 = tpu.reciprocal %12 {approx = true} : vector<16x64xf32> -> vector<16x64xf32>
    %14 = arith.mulf %5, %13 : vector<16x64xf32>
    %15 = arith.mulf %14, %7 : vector<16x64xf32>
    %c0_9 = arith.constant 0 : index
    %c0_10 = arith.constant 0 : index
    %16 = vector.load %arg7[%c0_9, %c0_10] : memref<16x32xf32, #tpu.memory_space<vmem>>, vector<16x32xf32>
    %c0_11 = arith.constant 0 : index
    %c0_12 = arith.constant 0 : index
    %17 = vector.load %arg5[%c0_11, %c0_12] : memref<32x64xf32, #tpu.memory_space<vmem>>, vector<32x64xf32>
    %cst_13 = arith.constant dense<0.000000e+00> : vector<16x32xf32>
    %18 = tpu.matmul %15, %17, %cst_13 {dimension_numbers = #tpu.dot_dimension_numbers<[1], [1], [0], [0], [0, 0, 1, 0], [], []>} : vector<16x64xf32>, vector<32x64xf32>, vector<16x32xf32> -> vector<16x32xf32>
    %19 = arith.addf %16, %18 : vector<16x32xf32>
    %c0_14 = arith.constant 0 : index
    %c0_15 = arith.constant 0 : index
    %20 = vector.load %arg7[%c0_14, %c0_15] : memref<16x32xf32, #tpu.memory_space<vmem>>, vector<16x32xf32>
    tpu.vector_store %arg7[%c0_14, %c0_15], %19 {strides = array<i32>} : memref<16x32xf32, #tpu.memory_space<vmem>>, vector<16x32xf32>,
    %c0_i32_16 = arith.constant 0 : i32
    %21 = arith.cmpi eq, %arg1, %c0_i32_16 : i32
    %22 = arith.extui %21 : i1 to i32
    %c0_i32_17 = arith.constant 0 : i32
    %23 = arith.cmpi ne, %22, %c0_i32_17 : i32
    scf.if %23 {
      %c0_18 = arith.constant 0 : index
      %c0_19 = arith.constant 0 : index
      %24 = vector.load %arg7[%c0_18, %c0_19] : memref<16x32xf32, #tpu.memory_space<vmem>>, vector<16x32xf32>
      %c0_20 = arith.constant 0 : index
      %c0_21 = arith.constant 0 : index
      %25 = vector.load %arg6[%c0_20, %c0_21] : memref<16x32xf32, #tpu.memory_space<vmem>>, vector<16x32xf32>
      tpu.vector_store %arg6[%c0_20, %c0_21], %24 {strides = array<i32>} : memref<16x32xf32, #tpu.memory_space<vmem>>, vector<16x32xf32>,
    } else {
    }
    return
  }
  func.func @transform_0(%arg0: i32, %arg1: i32) -> (i32, i32) {
    %c0_i32 = arith.constant 0 : i32
    %c0_i32_0 = arith.constant 0 : i32
    return %arg0, %c0_i32 : i32, i32
  }
  func.func @transform_1(%arg0: i32, %arg1: i32) -> (i32, i32) {
    %c0_i32 = arith.constant 0 : i32
    %c0_i32_0 = arith.constant 0 : i32
    return %arg1, %c0_i32 : i32, i32
  }
  func.func @transform_2(%arg0: i32, %arg1: i32) -> (i32, i32) {
    %c0_i32 = arith.constant 0 : i32
    %c0_i32_0 = arith.constant 0 : i32
    return %arg1, %c0_i32 : i32, i32
  }
  func.func @transform_3(%arg0: i32, %arg1: i32) -> (i32, i32) {
    %c0_i32 = arith.constant 0 : i32
    %c0_i32_0 = arith.constant 0 : i32
    return %c0_i32, %arg1 : i32, i32
  }
  func.func @transform_4(%arg0: i32, %arg1: i32) -> (i32, i32) {
    %c0_i32 = arith.constant 0 : i32
    %c0_i32_0 = arith.constant 0 : i32
    return %arg0, %c0_i32 : i32, i32
  }
}

</mosaic_0001>

<bundles_post_ra>
// kernel: tpu_custom_call.1
= control target key start
LH: loop header
LB: loop body
LE: loop exit
PB: predicated region body
PF: predicated region fallthrough
CT: control target
= control target key end

     0   :  { %vm22_vm0 = vcmask 261120   ;;  %s674_s0 = inlined_call_operand.vmem [shape: f32[16,32], index: 0, kind: input, shape index: {}]   ;;  %s675_s1 = inlined_call_operand.vmem [shape: f32[64,32], index: 1, kind: input, shape index: {}]   ;;  %s676_s2 = inlined_call_operand.vmem [shape: f32[64,32], index: 2, kind: input, shape index: {}]   ;;  %s677_s3 = inlined_call_operand.vmem [shape: f32[32,64], index: 3, kind: input, shape index: {}]   ;;  %s678_s4 = inlined_call_operand.hbm [shape: f32[16,32], index: 4, kind: output, shape index: {}]  }
   0x1   :  { %v34_v0 = vld [vmem:[%s675_s1 + $0x38] sm:$0xff]  ;;  %v33_v1 = vld [vmem:[%s675_s1 + $0x30] sm:$0xff]  ;;  %v25_v2 = vld [vmem:[%s674_s0] sm:$0xff] }
   0x2   :  { %441 = vmatprep.subr.msk.mxu0 %vm22_vm0, %v34_v0  ;;  %457 = vmatprep.mubr.msk.f32.mxu0 %vm22_vm0, %v25_v2  ;;  %v148_v3 = vld [vmem:[%s676_s2 + $0x38] sm:$0xff]  ;;  %v147_v4 = vld [vmem:[%s676_s2 + $0x30] sm:$0xff]  ;;  %v32_v5 = vld [vmem:[%s675_s1 + $0x28] sm:$0xff] }
   0x3   :  { %442 = vmatpush3.xpose.msk.msra.mxu0 %vm22_vm0, %v34_v0  ;;  %460 = vmatprep.subr.msk.mxu1 %vm22_vm0, %v148_v3 }
   0x4   :  { %443 = vmatprep.subr.msk.mxu0 %vm22_vm0, %v33_v1  ;;  %476 = vmatprep.mubr.msk.f32.mxu1 %vm22_vm0, %v25_v2 }
   0x5   :  { %461 = vmatpush3.xpose.msk.msra.mxu1 %vm22_vm0, %v148_v3 }
   0x6   :  { %462 = vmatprep.subr.msk.mxu1 %vm22_vm0, %v147_v4 }
   0x7   :  { %444 = vmatpush3.xpose.msk.msra.mxu0 %vm22_vm0, %v33_v1 }
   0x8   :  { %9 = vsyncpa [#allocation4], 0  ;;  %445 = vmatprep.subr.msk.mxu0 %vm22_vm0, %v32_v5  ;;  %v146_v6 = vld [vmem:[%s676_s2 + $0x28] sm:$0xff]  ;;  %v31_v7 = vld [vmem:[%s675_s1 + $0x20] sm:$0xff]  ;;  %vm268_vm1 = vcmask 523264   ;;  %v524_v22 = vmov 0.0  }
   0x9   :  { %463 = vmatpush3.xpose.msk.msra.mxu1 %vm22_vm0, %v147_v4  ;;  %v145_v8 = vld [vmem:[%s676_s2 + $0x20] sm:$0xff]  ;;  %v30_v9 = vld [vmem:[%s675_s1 + $0x18] sm:$0xff]  ;;  %v29_v11 = vld [vmem:[%s675_s1 + $0x10] sm:$0xff]  ;;  %24 = vst.msk [vmem:[#allocation2 + $0x8] sm:$0xff] %vm22_vm0, %v524_v22 }
   0xa   :  { %464 = vmatprep.subr.msk.mxu1 %vm22_vm0, %v146_v6  ;;  %v144_v10 = vld [vmem:[%s676_s2 + $0x18] sm:$0xff]  ;;  %v143_v12 = vld [vmem:[%s676_s2 + $0x10] sm:$0xff]  ;;  %v28_v13 = vld [vmem:[%s675_s1 + $0x8] sm:$0xff]  ;;  %23 = vst.msk [vmem:[#allocation2] sm:$0xff] %vm22_vm0, %v524_v22 }
   0xb   :  { %446 = vmatpush3.xpose.msk.msra.mxu0 %vm22_vm0, %v32_v5  ;;  %v142_v14 = vld [vmem:[%s676_s2 + $0x8] sm:$0xff]  ;;  %v27_v15 = vld [vmem:[%s675_s1] sm:$0xff]  ;;  %v267_v18 = vld [vmem:[%s677_s3 + $0x18] sm:$0xff] }
   0xc   :  { %447 = vmatprep.subr.msk.mxu0 %vm22_vm0, %v31_v7  ;;  %v141_v16 = vld [vmem:[%s676_s2] sm:$0xff]  ;;  %v26_v17 = vld [vmem:[%s674_s0 + $0x8] sm:$0xff]  ;;  %v266_v19 = vld [vmem:[%s677_s3 + $0x10] sm:$0xff] }
   0xd   :  { %465 = vmatpush3.xpose.msk.msra.mxu1 %vm22_vm0, %v146_v6  ;;  %v265_v20 = vld [vmem:[%s677_s3 + $0x8] sm:$0xff]  ;;  %v264_v21 = vld [vmem:[%s677_s3] sm:$0xff]  ;;  %s525_s3 = smov [#allocation3]  }
   0xe   :  { %466 = vmatprep.subr.msk.mxu1 %vm22_vm0, %v145_v8  ;;  %s378_s30 = sshll.u32 %s525_s3, 4  ;;  %s379_s30 = int_to_ptr.vmem [resolvable:$true] %s378_s30 }
   0xf   :  { %448 = vmatpush3.xpose.msk.msra.mxu0 %vm22_vm0, %v31_v7  ;;  %s502_s5 = scalar_lea.vmem %s379_s30, 256  ;;  %p507_p1 = scmp.lt.s32.totalorder %s379_s30, %s379_s30 }
  0x10   :  { %449 = vmatprep.subr.msk.mxu0 %vm22_vm0, %v30_v9  ;;  %v263_v41 = vld [vmem:[#allocation2 + $0x8] sm:$0xff]  ;;  %p503_p0 = scmp.ne.s32.totalorder %s379_s30, %s502_s5  ;;  %p508_p2 = scmp.lt.s32.totalorder %s502_s5, %s502_s5 }
  0x11   :  { %467 = vmatpush3.xpose.msk.msra.mxu1 %vm22_vm0, %v145_v8  ;;  %v262_v43 = vld [vmem:[#allocation2] sm:$0xff] }
  0x12   :  { %468 = vmatprep.subr.msk.mxu1 %vm22_vm0, %v144_v10  ;;  %p509_p3 = por %p508_p2, %p507_p1 }
  0x13   :  { %450 = vmatpush3.xpose.msk.msra.mxu0 %vm22_vm0, %v30_v9 }
  0x14   :  { %451 = vmatprep.subr.msk.mxu0 %vm22_vm0, %v29_v11  ;;  %p510_p4 = pnand %p509_p3, %p503_p0 }
  0x15   :  { %469 = vmatpush3.xpose.msk.msra.mxu1 %vm22_vm0, %v144_v10 }
  0x16   :  { %470 = vmatprep.subr.msk.mxu1 %vm22_vm0, %v143_v12 }
  0x17   :  { %452 = vmatpush3.xpose.msk.msra.mxu0 %vm22_vm0, %v29_v11 }
  0x18   :  { %453 = vmatprep.subr.msk.mxu0 %vm22_vm0, %v28_v13 }
  0x19   :  { %471 = vmatpush3.xpose.msk.msra.mxu1 %vm22_vm0, %v143_v12 }
  0x1a   :  { %472 = vmatprep.subr.msk.mxu1 %vm22_vm0, %v142_v14 }
  0x1b   :  { %454 = vmatpush3.xpose.msk.msra.mxu0 %vm22_vm0, %v28_v13 }
  0x1c   :  { %455 = vmatprep.subr.msk.mxu0 %vm22_vm0, %v27_v15 }
  0x1d   :  { %473 = vmatpush3.xpose.msk.msra.mxu1 %vm22_vm0, %v142_v14 }
  0x1e   :  { %474 = vmatprep.subr.msk.mxu1 %vm22_vm0, %v141_v16 }
  0x1f   :  { %456 = vmatpush3.xpose.msk.msra.mxu0 %vm22_vm0, %v27_v15 }
  0x20   :  { %479 = vmatprep.subr.msk.mxu0 %vm268_vm1, %v267_v18 }
  0x21   :  { %475 = vmatpush3.xpose.msk.msra.mxu1 %vm22_vm0, %v141_v16 }
  0x22   :  { %458 = vmatmul.mubr.msk.f32.vlgmr.msra.gmra.mxu0 %vm22_vm0, %v26_v17 }
  0x23   :  { %480 = vmatpush3.xpose.msk.msra.mxu0 %vm268_vm1, %v267_v18 }
  0x24   :  { %477 = vmatmul.mubr.msk.f32.vlgmr.msra.gmra.mxu1 %vm22_vm0, %v26_v17  ;;  %481 = vmatprep.subr.msk.mxu0 %vm268_vm1, %v266_v19 }
  0x27   :  { %482 = vmatpush3.xpose.msk.msra.mxu0 %vm268_vm1, %v266_v19 }
  0x28   :  { %483 = vmatprep.subr.msk.mxu0 %vm268_vm1, %v265_v20 }
  0x2b   :  { %484 = vmatpush3.xpose.msk.msra.mxu0 %vm268_vm1, %v265_v20 }
  0x2c   :  { %485 = vmatprep.subr.msk.mxu0 %vm268_vm1, %v264_v21 }
  0x2f   :  { %486 = vmatpush3.xpose.msk.msra.mxu0 %vm268_vm1, %v264_v21 }
  0xe2   :  { %v459_v23 = vpop.f32.mrf.mxu0 }
  0xe3   :  { %v249_v24 = vsub.f32 0.0, %v459_v23 }
  0xe4   :  { %v132_v25 = vpop.f32.mrf.mxu0  ;;  %v478_v34 = vpop.f32.mrf.mxu1 }
  0xe5   :  { %v252_v26 = vmul.f32 1.442695, %v249_v24  ;;  %v248_v27 = vsub.f32 0.0, %v132_v25 }
  0xe6   :  { %v239_v38 = vpop.f32.mrf.mxu1 }
  0xe7   :  { %494 = vpow2.f32 %v252_v26  ;;  %v250_v28 = vmul.f32 1.442695, %v248_v27 }
  0xe9   :  { %496 = vpow2.f32 %v250_v28 }
  0xf4   :  { %v495_v29 = vpop.eup %494 }
  0xf5   :  { %v255_v30 = vadd.f32 1.0, %v495_v29 }
  0xf6   :  { %v497_v31 = vpop.eup %496 }
  0xf7   :  { %498 = vrcp.f32 %v255_v30  ;;  %v254_v32 = vadd.f32 1.0, %v497_v31 }
  0xf9   :  { %500 = vrcp.f32 %v254_v32 }
 0x104   :  { %v499_v33 = vpop.eup %498 }
 0x105   :  { %v259_v36 = vmul.f32 %v499_v33, %v459_v23 }
 0x106   :  { %v501_v35 = vpop.eup %500 }
 0x107   :  { %v258_v37 = vmul.f32 %v501_v35, %v132_v25  ;;  %v261_v40 = vmul.f32 %v478_v34, %v259_v36 }
 0x109   :  { %v260_v39 = vmul.f32 %v258_v37, %v239_v38 }
 0x10b   :  { %487 = vmatprep.mubr.msk.f32.mxu0 %vm268_vm1, %v260_v39 }
 0x10c   :  { %488 = vmatmul.mubr.msk.f32.vlgmr.msra.gmra.mxu0 %vm268_vm1, %v261_v40 }
 0x1cc   :  { %v489_v42 = vpop.f32.mrf.mxu0 }
 0x1cd   :  { %v363_v44 = vadd.f32 %v489_v42, %v263_v41 }
 0x1ce   :  { %v353_v45 = vpop.f32.mrf.mxu0 }
 0x1cf   :  { %365 = vst.msk [vmem:[#allocation2 + $0x8] sm:$0xff] %vm22_vm0, %v363_v44  ;;  %v362_v46 = vadd.f32 %v353_v45, %v262_v43 }
 0x1d1   :  { %364 = vst.msk [vmem:[#allocation2] sm:$0xff] %vm22_vm0, %v362_v46 }
 0x1d6   :  { %v370_v47 = vld [vmem:[#allocation2 + $0x8] sm:$0xff] }
 0x1d7   :  { %372 = vst.msk [vmem:[#allocation3 + $0x8] sm:$0xff] %vm22_vm0, %v370_v47 }
 0x1d8   :  { %v369_v48 = vld [vmem:[#allocation2] sm:$0xff] }
 0x1d9   :  { %371 = vst.msk [vmem:[#allocation3] sm:$0xff] %vm22_vm0, %v369_v48 }
 0x1da   :  { %513 = shalt.err (!%p510_p4)
}
 0x1db   :  { %s526_s6 = smov 128   ;;  %s527_s7 = smov 8  }
 0x1dc   :  { %384 = dma.vmem_to_hbm [thread:$0]  %s379_s30, 256, %s678_s4, [#allocation4], %s526_s6, %s526_s6, %s527_s7  }
 0x1dd   :  { %522 = dma.done.wait [#allocation4], 256  }
 0x1de   :  { %523 = vsyncadd [#allocation4], 4294967040 }
 0x1df   :  { %388 = vsyncpa [#allocation4], 1 }

</bundles_post_ra>
